<compile_context>
chip_gen: v5e
topology: v5e:2x2
jax: 0.10.0
libtpu: 0.0.40
codegen_flags: <defaults>
</compile_context>

<pallas_src>
import jax
import jax.numpy as jnp
from jax.experimental import pallas as pl
from jax.experimental.pallas import tpu as pltpu

# ---------------- fixture sizes (tests/test_deep_lift_shap.py::X) -------------
N, C, L = 16, 4, 100      # batch, one-hot channels, sequence length


# ------------------------------ Pallas kernel ----------------------------------
def _rowsum_kernel(x_ref, o_ref):
    """Row-wise sum: x (N, D) -> o (1, N), lane-dense output.

    D sits on the 128-lane axis, so the whole sum is one lane-axis reduce
    (vreg-tree adds + one intra-vreg reduce).  Mosaic's logical-shape-aware
    reduce handles the D -> next-multiple-of-128 lane padding because the
    block is the full array (no explicit masking needed).
    """
    o_ref[...] = jnp.sum(x_ref[...], axis=-1)[None, :]      # (1, N)


def torch_sum_pallas(X):
    """Pallas implementation of TorchSum.forward for 2-D or 3-D inputs."""
    if X.ndim == 3:
        n = X.shape[0]
        Xf = X.reshape(n, X.shape[1] * X.shape[2])   # (N, C*L): free HBM reshape
    elif X.ndim == 2:
        n = X.shape[0]
        Xf = X
    else:
        raise ValueError("TorchSum expects a 2-D or 3-D input")

    if Xf.dtype != jnp.float32:
        Xf = Xf.astype(jnp.float32)

    out = pl.pallas_call(
        _rowsum_kernel,
        out_shape=jax.ShapeDtypeStruct((1, n), jnp.float32),
        in_specs=[pl.BlockSpec(memory_space=pltpu.MemorySpace.VMEM)],
        out_specs=pl.BlockSpec(memory_space=pltpu.MemorySpace.VMEM),
    )(Xf)
    return out.reshape(n, 1)                          # (N, 1), matches torch spec


class TorchSum:
    """JAX/Pallas port of the PyTorch TorchSum module."""

    def forward(self, X):
        return torch_sum_pallas(X)

    __call__ = forward


# --------------------------- deterministic inputs ------------------------------
def random_one_hot(shape, key):
    n, c, l = shape
    idx = jax.random.randint(key, (n, l), 0, c)
    return jax.nn.one_hot(idx, c, dtype=jnp.float32).transpose(0, 2, 1)  # (n, c, l)


def substitute(X, motif):
    lut = {"A": 0, "C": 1, "G": 2, "T": 3}
    idx = jnp.array([lut[ch] for ch in motif], dtype=jnp.int32)
    oh = jax.nn.one_hot(idx, C, dtype=jnp.float32).T                     # (C, len)
    start = (L - len(motif)) // 2
    return X.at[:, :, start:start + len(motif)].set(oh[None, :, :])


if __name__ == "__main__":
    key = jax.random.PRNGKey(0)
    kx, k2 = jax.random.split(key, 2)

    # Fixture-equivalent input: one-hot (16, 4, 100) with 'ACGTACGT' substituted.
    X = substitute(random_one_hot((N, C, L), kx), "ACGTACGT")

    model = TorchSum()

    # 3-D branch: sum over (-1, -2), unsqueeze(-1) -> (16, 1)
    out3 = jax.block_until_ready(model(X))
    ref3 = jnp.sum(X, axis=(-1, -2))[:, None]
    assert out3.shape == (N, 1)
    assert jnp.allclose(out3, ref3, atol=1e-4, rtol=1e-4), "3D mismatch vs reference"

    # 2-D branch: sum over -1 with keepdims -> (16, 1)
    X2 = jax.random.normal(k2, (N, 32), dtype=jnp.float32)
    out2 = jax.block_until_ready(model(X2))
    ref2 = jnp.sum(X2, axis=-1, keepdims=True)
    assert out2.shape == (N, 1)
    assert jnp.allclose(out2, ref2, atol=1e-4, rtol=1e-4), "2D mismatch vs reference"

    print("KERNEL_OK")
</pallas_src>

<mosaic_0001>
module attributes {stable_mosaic.version = 11 : i64} {
  func.func @_rowsum_kernel(%arg0: memref<16x400xf32, #tpu.memory_space<vmem>>, %arg1: memref<1x16xf32, #tpu.memory_space<vmem>>) attributes {dimension_semantics = [], scalar_prefetch = 0 : i64, scratch_operands = 0 : i64, tpu.core_type = #tpu.core_type<tc>} {
    %c0 = arith.constant 0 : index
    %c0_0 = arith.constant 0 : index
    %0 = vector.load %arg0[%c0, %c0_0] : memref<16x400xf32, #tpu.memory_space<vmem>>, vector<16x400xf32>
    %cst = arith.constant dense<0.000000e+00> : vector<16xf32>
    %1 = vector.multi_reduction <add>, %0, %cst [1] : vector<16x400xf32> to vector<16xf32>
    %2 = vector.shape_cast %1 : vector<16xf32> to vector<1x16xf32>
    %c0_1 = arith.constant 0 : index
    %c0_2 = arith.constant 0 : index
    %3 = vector.load %arg1[%c0_1, %c0_2] : memref<1x16xf32, #tpu.memory_space<vmem>>, vector<1x16xf32>
    tpu.vector_store %arg1[%c0_1, %c0_2], %2 {strides = array<i32>} : memref<1x16xf32, #tpu.memory_space<vmem>>, vector<1x16xf32>,
    return
  }
}

</mosaic_0001>

<bundles_post_ra>
// kernel: tpu_custom_call.1
= control target key start
LH: loop header
LB: loop body
LE: loop exit
PB: predicated region body
PF: predicated region fallthrough
CT: control target
= control target key end

     0   :  { %6 = vsyncpa [#allocation3], 0  ;;  %s153_s0 = inlined_call_operand.hbm [shape: f32[16,400], index: 0, kind: input, shape index: {}]   ;;  %s154_s1 = inlined_call_operand.hbm [shape: f32[1,16], index: 1, kind: output, shape index: {}]  }
   0x1   :  { %7 = vsyncpa [#allocation4], 0  ;;  %s12_s8 = sshll.u32 %s153_s0, 4  ;;  %s131_s9 = smov [#allocation2]   ;;  %s13_s8 = int_to_ptr.hbm [resolvable:$true] %s12_s8 }
   0x2   :  { %s14_s10 = sshll.u32 %s131_s9, 4  ;;  %s132_s11 = smov 512   ;;  %s15_s10 = int_to_ptr.vmem [resolvable:$true] %s14_s10 }
   0x3   :  { %s133_s12 = smov 32  }
   0x4   :  { %20 = dma.hbm_to_vmem [thread:$0]  %s13_s8, 1024, %s15_s10, [#allocation3], %s132_s11, %s132_s11, %s133_s12  }
   0x5   :  { %127 = dma.done.wait [#allocation3], 1024  }
   0x6   :  { %128 = vsyncadd [#allocation3], 4294966272  ;;  %vm35_vm0 = vcmask 130048   ;;  %v25_v0 = vld [vmem:[#allocation2] sm:$0xff]  ;;  %v26_v1 = vld [vmem:[#allocation2 + $0x8] sm:$0xff]  ;;  %v48_v16 = vlaneseq  ;;  %s134_s0 = smov [#allocation5]  }
   0x7   :  { %v27_v2 = vld [vmem:[#allocation2 + $0x10] sm:$0xff]  ;;  %v28_v3 = vld [vmem:[#allocation2 + $0x18] sm:$0xff]  ;;  %v33_v4 = vadd.f32 %v26_v1, %v25_v0  ;;  %v29_v5 = vld [vmem:[#allocation2 + $0x20] sm:$0xff]  ;;  %s63_s13 = sshll.u32 %s134_s0, 4  ;;  %s65_s16 = sshll.u32 %s154_s1, 4  ;;  %vm53_vm1 = vcmask 130112   ;;  %s64_s13 = int_to_ptr.vmem [resolvable:$true] %s63_s13  ;;  %s66_s16 = int_to_ptr.hbm [resolvable:$true] %s65_s16 }
   0x8   :  { %v30_v6 = vld [vmem:[#allocation2 + $0x28] sm:$0xff]  ;;  %v36_v7 = vsel %vm35_vm0, %v28_v3, 0.0  ;;  %v31_v10 = vld [vmem:[#allocation2 + $0x30] sm:$0xff]  ;;  %v32_v12 = vld [vmem:[#allocation2 + $0x38] sm:$0xff]  ;;  %v49_v18 = vand.u32 127, %v48_v16  ;;  %vm56_vm2 = vcmask 122880  }
   0x9   :  { %v34_v8 = vadd.f32 %v33_v4, %v27_v2  ;;  %v40_v9 = vadd.f32 %v30_v6, %v29_v5  ;;  %v42_v14 = vsel %vm35_vm0, %v32_v12, 0.0 }
   0xa   :  { %v51_v19 = vadd.s32 4294967288, %v49_v18 }
   0xb   :  { %v37_v11 = vadd.f32 %v36_v7, %v34_v8  ;;  %v41_v13 = vadd.f32 %v40_v9, %v31_v10 }
   0xd   :  { %38 = vadd.xlane.f32.xlu0 %v37_v11  ;;  %v43_v15 = vadd.f32 %v42_v14, %v41_v13 }
  0x15   :  { %44 = vadd.xlane.f32.xlu0 %v43_v15 }
  0x80   :  { %v39_v17 = vpop.xlane.xlu0 %38 }
  0x81   :  { %v50_v21 = vperm.slane %v39_v17, %v49_v18 }
  0x88   :  { %v45_v20 = vpop.xlane.xlu0 %44 }
  0x89   :  { %v52_v22 = vperm.slane %v45_v20, %v51_v19 }
  0x8b   :  { %v54_v23 = vsel %vm53_vm1, %v52_v22, %v50_v21 }
  0x8c   :  { %57 = vst.msk [vmem:[#allocation5] sm:$0x1] %vm56_vm2, %v54_v23 }
  0x8d   :  { %68 = dma.vmem_to_hbm [thread:$0]  %s64_s13, 16, %s66_s16, [#allocation4]  }
  0x8e   :  { %129 = dma.done.wait [#allocation4], 16  }
  0x8f   :  { %130 = vsyncadd [#allocation4], 4294967280 }
  0x90   :  { %73 = vsyncpa [#allocation3], 1 }
  0x91   :  { %74 = vsyncpa [#allocation4], 1 }

</bundles_post_ra>
